<compile_context>
chip_gen: v7x
topology: tpu7x:2x2x1
jax: 0.10.0
libtpu: 0.0.40
codegen_flags: <defaults>
</compile_context>

<pallas_src>
import functools

import jax
import jax.numpy as jnp
from jax.experimental import pallas as pl
from jax.experimental.pallas import tpu as pltpu


def _smallnn_kernel(x_ref, w1_ref, b1_ref, w2_ref, b2_ref, w3_ref, b3_ref, o_ref):
    # x arrives f32; cast to bf16 in-register (VPU cast is free vs DMA).
    x = x_ref[...].astype(jnp.bfloat16)

    # fc1 + ReLU (bf16 operands, f32 accumulation, f32 bias add)
    h1 = jnp.dot(x, w1_ref[...], preferred_element_type=jnp.float32) + b1_ref[...]
    h1 = jnp.maximum(h1, 0.0).astype(jnp.bfloat16)

    # fc2 + ReLU
    h2 = jnp.dot(h1, w2_ref[...], preferred_element_type=jnp.float32) + b2_ref[...]
    h2 = jnp.maximum(h2, 0.0).astype(jnp.bfloat16)

    # fc3 (no activation); output stays f32, un-padded (last dim == out_size).
    out = jnp.dot(h2, w3_ref[...], preferred_element_type=jnp.float32) + b3_ref[...]
    o_ref[...] = out.astype(o_ref.dtype)


@functools.partial(jax.jit, static_argnames=("tile_b",))
def smallnn_forward(x, w1, b1, w2, b2, w3, b3, *, tile_b=2048):
    """x: [B, in_size] f32.  Weights bf16 [fan_in, fan_out], biases f32 [1, fan_out]
    (as produced by prepare_params)."""
    B, in_size = x.shape
    H1 = w1.shape[1]
    H2 = w2.shape[1]
    out_size = w3.shape[1]

    # Batch tile: multiple of 8 sublanes, capped at tile_b, never larger than
    # needed for B.  Partial final blocks are handled by Pallas (no pad copy).
    tb = min(tile_b, B)
    tb = max(8, ((tb + 7) // 8) * 8)
    n_tiles = pl.cdiv(B, tb)

    resident = lambda shape: pl.BlockSpec(shape, lambda i: (0, 0))  # noqa: E731

    out = pl.pallas_call(
        _smallnn_kernel,
        out_shape=jax.ShapeDtypeStruct((B, out_size), jnp.float32),
        grid_spec=pl.GridSpec(
            grid=(n_tiles,),
            in_specs=[
                pl.BlockSpec((tb, in_size), lambda i: (i, 0)),   # streamed x tile
                resident((in_size, H1)), resident((1, H1)),       # fc1 (resident)
                resident((H1, H2)),      resident((1, H2)),       # fc2 (resident)
                resident((H2, out_size)), resident((1, out_size)),  # fc3 (resident)
            ],
            out_specs=pl.BlockSpec((tb, out_size), lambda i: (i, 0)),
        ),
        compiler_params=pltpu.CompilerParams(
            dimension_semantics=("parallel",),   # shard batch tiles across TCs (v7x)
            vmem_limit_bytes=48 << 20,           # headroom vs 64 MiB/TC on v7x
        ),
    )(x, w1, b1, w2, b2, w3, b3)

    return out


def prepare_params(w1, b1, w2, b2, w3, b3):
    """One-time param formatting (hoisted out of the forward pass):
    bf16 weights [fan_in, fan_out], f32 biases reshaped to [1, fan_out]."""
    fmt_w = lambda w: w.astype(jnp.bfloat16)                    # noqa: E731
    fmt_b = lambda b: b.reshape(1, -1).astype(jnp.float32)      # noqa: E731
    return fmt_w(w1), fmt_b(b1), fmt_w(w2), fmt_b(b2), fmt_w(w3), fmt_b(b3)


def init_params(key, in_size, out_size, hidden=(64, 32)):
    """Deterministic init mimicking PyTorch nn.Linear default
    (U[-1/sqrt(fan_in), +1/sqrt(fan_in)]).  Weights stored [fan_in, fan_out]
    (transpose of PyTorch's [out, in]); biases [fan_out]."""
    dims = [in_size, hidden[0], hidden[1], out_size]
    params = []
    for i in range(3):
        fan_in, fan_out = dims[i], dims[i + 1]
        key, kw, kb = jax.random.split(key, 3)
        bound = 1.0 / jnp.sqrt(jnp.float32(fan_in))
        w = jax.random.uniform(kw, (fan_in, fan_out), jnp.float32, -bound, bound)
        b = jax.random.uniform(kb, (fan_out,), jnp.float32, -bound, bound)
        params += [w, b]
    return params


if __name__ == "__main__":
    in_size, out_size = 16, 4
    hidden = (64, 32)
    batch = 250          # not a multiple of the tile -> exercises partial final block
    tile_b = 64          # small tile so the demo runs a multi-step pipelined grid

    key = jax.random.PRNGKey(0)
    key, kx = jax.random.split(key)
    x = jax.random.normal(kx, (batch, in_size), jnp.float32)

    w1, b1, w2, b2, w3, b3 = init_params(key, in_size, out_size, hidden)
    w1b, b1f, w2b, b2f, w3b, b3f = prepare_params(w1, b1, w2, b2, w3, b3)

    out = smallnn_forward(x, w1b, b1f, w2b, b2f, w3b, b3f, tile_b=tile_b)
    jax.block_until_ready(out)

    # Pure-JAX reference using the same bf16-weight / f32-accumulate recipe.
    xb = x.astype(jnp.bfloat16)
    h = jnp.maximum(jnp.dot(xb, w1b, preferred_element_type=jnp.float32) + b1f, 0.0)
    h = jnp.maximum(jnp.dot(h.astype(jnp.bfloat16), w2b,
                            preferred_element_type=jnp.float32) + b2f, 0.0)
    ref = jnp.dot(h.astype(jnp.bfloat16), w3b,
                  preferred_element_type=jnp.float32) + b3f

    assert out.shape == (batch, out_size)
    assert jnp.allclose(out, ref, atol=1e-3, rtol=1e-3)

    # Also sanity-check against the full-f32 PyTorch-equivalent forward.
    ref32 = jnp.maximum(x @ w1 + b1[None, :], 0.0)
    ref32 = jnp.maximum(ref32 @ w2 + b2[None, :], 0.0)
    ref32 = ref32 @ w3 + b3[None, :]
    assert jnp.allclose(out, ref32, atol=5e-2, rtol=5e-2)

    print("KERNEL_OK")
</pallas_src>

<mosaic_0001>
module attributes {stable_mosaic.version = 11 : i64} {
  func.func @_smallnn_kernel(%arg0: i32, %arg1: memref<64x16xf32, #tpu.memory_space<vmem>>, %arg2: memref<16x64xbf16, #tpu.memory_space<vmem>>, %arg3: memref<1x64xf32, #tpu.memory_space<vmem>>, %arg4: memref<64x32xbf16, #tpu.memory_space<vmem>>, %arg5: memref<1x32xf32, #tpu.memory_space<vmem>>, %arg6: memref<32x4xbf16, #tpu.memory_space<vmem>>, %arg7: memref<1x4xf32, #tpu.memory_space<vmem>>, %arg8: memref<64x4xf32, #tpu.memory_space<vmem>>) attributes {dimension_semantics = [#tpu.dimension_semantics<parallel>], iteration_bounds = array<i64: 4>, scalar_prefetch = 0 : i64, scratch_operands = 0 : i64, tpu.core_type = #tpu.core_type<tc>, window_params = [{transform_indices = @transform_0, window_bounds = array<i64: 64, 16>}, {pipeline_mode = #tpu.pipeline_mode<synchronous>, transform_indices = @transform_1, window_bounds = array<i64: 16, 64>}, {pipeline_mode = #tpu.pipeline_mode<synchronous>, transform_indices = @transform_2, window_bounds = array<i64: 1, 64>}, {pipeline_mode = #tpu.pipeline_mode<synchronous>, transform_indices = @transform_3, window_bounds = array<i64: 64, 32>}, {pipeline_mode = #tpu.pipeline_mode<synchronous>, transform_indices = @transform_4, window_bounds = array<i64: 1, 32>}, {pipeline_mode = #tpu.pipeline_mode<synchronous>, transform_indices = @transform_5, window_bounds = array<i64: 32, 4>}, {pipeline_mode = #tpu.pipeline_mode<synchronous>, transform_indices = @transform_6, window_bounds = array<i64: 1, 4>}, {transform_indices = @transform_7, window_bounds = array<i64: 64, 4>}]} {
    %c0 = arith.constant 0 : index
    %c0_0 = arith.constant 0 : index
    %0 = vector.load %arg1[%c0, %c0_0] : memref<64x16xf32, #tpu.memory_space<vmem>>, vector<64x16xf32>
    %1 = arith.truncf %0 : vector<64x16xf32> to vector<64x16xbf16>
    %c0_1 = arith.constant 0 : index
    %c0_2 = arith.constant 0 : index
    %2 = vector.load %arg2[%c0_1, %c0_2] : memref<16x64xbf16, #tpu.memory_space<vmem>>, vector<16x64xbf16>
    %cst = arith.constant dense<0.000000e+00> : vector<64x64xf32>
    %3 = tpu.matmul %1, %2, %cst {dimension_numbers = #tpu.dot_dimension_numbers<[1], [0], [0], [1], [0, 0, 1, 1], [], []>} : vector<64x16xbf16>, vector<16x64xbf16>, vector<64x64xf32> -> vector<64x64xf32>
    %c0_3 = arith.constant 0 : index
    %c0_4 = arith.constant 0 : index
    %4 = vector.load %arg3[%c0_3, %c0_4] : memref<1x64xf32, #tpu.memory_space<vmem>>, vector<1x64xf32>
    %5 = vector.broadcast %4 : vector<1x64xf32> to vector<64x64xf32>
    %6 = arith.addf %3, %5 : vector<64x64xf32>
    %cst_5 = arith.constant 0.000000e+00 : f32
    %7 = vector.broadcast %cst_5 : f32 to vector<64x64xf32>
    %8 = arith.maximumf %6, %7 : vector<64x64xf32>
    %9 = arith.truncf %8 : vector<64x64xf32> to vector<64x64xbf16>
    %c0_6 = arith.constant 0 : index
    %c0_7 = arith.constant 0 : index
    %10 = vector.load %arg4[%c0_6, %c0_7] : memref<64x32xbf16, #tpu.memory_space<vmem>>, vector<64x32xbf16>
    %cst_8 = arith.constant dense<0.000000e+00> : vector<64x32xf32>
    %11 = tpu.matmul %9, %10, %cst_8 {dimension_numbers = #tpu.dot_dimension_numbers<[1], [0], [0], [1], [0, 0, 1, 1], [], []>} : vector<64x64xbf16>, vector<64x32xbf16>, vector<64x32xf32> -> vector<64x32xf32>
    %c0_9 = arith.constant 0 : index
    %c0_10 = arith.constant 0 : index
    %12 = vector.load %arg5[%c0_9, %c0_10] : memref<1x32xf32, #tpu.memory_space<vmem>>, vector<1x32xf32>
    %13 = vector.broadcast %12 : vector<1x32xf32> to vector<64x32xf32>
    %14 = arith.addf %11, %13 : vector<64x32xf32>
    %cst_11 = arith.constant 0.000000e+00 : f32
    %15 = vector.broadcast %cst_11 : f32 to vector<64x32xf32>
    %16 = arith.maximumf %14, %15 : vector<64x32xf32>
    %17 = arith.truncf %16 : vector<64x32xf32> to vector<64x32xbf16>
    %c0_12 = arith.constant 0 : index
    %c0_13 = arith.constant 0 : index
    %18 = vector.load %arg6[%c0_12, %c0_13] : memref<32x4xbf16, #tpu.memory_space<vmem>>, vector<32x4xbf16>
    %cst_14 = arith.constant dense<0.000000e+00> : vector<64x4xf32>
    %19 = tpu.matmul %17, %18, %cst_14 {dimension_numbers = #tpu.dot_dimension_numbers<[1], [0], [0], [1], [0, 0, 1, 1], [], []>} : vector<64x32xbf16>, vector<32x4xbf16>, vector<64x4xf32> -> vector<64x4xf32>
    %c0_15 = arith.constant 0 : index
    %c0_16 = arith.constant 0 : index
    %20 = vector.load %arg7[%c0_15, %c0_16] : memref<1x4xf32, #tpu.memory_space<vmem>>, vector<1x4xf32>
    %21 = vector.broadcast %20 : vector<1x4xf32> to vector<64x4xf32>
    %22 = arith.addf %19, %21 : vector<64x4xf32>
    %c0_17 = arith.constant 0 : index
    %c0_18 = arith.constant 0 : index
    %23 = vector.load %arg8[%c0_17, %c0_18] : memref<64x4xf32, #tpu.memory_space<vmem>>, vector<64x4xf32>
    tpu.vector_store %arg8[%c0_17, %c0_18], %22 {strides = array<i32>} : memref<64x4xf32, #tpu.memory_space<vmem>>, vector<64x4xf32>,
    return
  }
  func.func @transform_0(%arg0: i32) -> (i32, i32) {
    %c0_i32 = arith.constant 0 : i32
    %c0_i32_0 = arith.constant 0 : i32
    return %arg0, %c0_i32 : i32, i32
  }
  func.func @transform_1(%arg0: i32) -> (i32, i32) {
    %c0_i32 = arith.constant 0 : i32
    %c0_i32_0 = arith.constant 0 : i32
    %c0_i32_1 = arith.constant 0 : i32
    return %c0_i32, %c0_i32_0 : i32, i32
  }
  func.func @transform_2(%arg0: i32) -> (i32, i32) {
    %c0_i32 = arith.constant 0 : i32
    %c0_i32_0 = arith.constant 0 : i32
    %c0_i32_1 = arith.constant 0 : i32
    return %c0_i32, %c0_i32_0 : i32, i32
  }
  func.func @transform_3(%arg0: i32) -> (i32, i32) {
    %c0_i32 = arith.constant 0 : i32
    %c0_i32_0 = arith.constant 0 : i32
    %c0_i32_1 = arith.constant 0 : i32
    return %c0_i32, %c0_i32_0 : i32, i32
  }
  func.func @transform_4(%arg0: i32) -> (i32, i32) {
    %c0_i32 = arith.constant 0 : i32
    %c0_i32_0 = arith.constant 0 : i32
    %c0_i32_1 = arith.constant 0 : i32
    return %c0_i32, %c0_i32_0 : i32, i32
  }
  func.func @transform_5(%arg0: i32) -> (i32, i32) {
    %c0_i32 = arith.constant 0 : i32
    %c0_i32_0 = arith.constant 0 : i32
    %c0_i32_1 = arith.constant 0 : i32
    return %c0_i32, %c0_i32_0 : i32, i32
  }
  func.func @transform_6(%arg0: i32) -> (i32, i32) {
    %c0_i32 = arith.constant 0 : i32
    %c0_i32_0 = arith.constant 0 : i32
    %c0_i32_1 = arith.constant 0 : i32
    return %c0_i32, %c0_i32_0 : i32, i32
  }
  func.func @transform_7(%arg0: i32) -> (i32, i32) {
    %c0_i32 = arith.constant 0 : i32
    %c0_i32_0 = arith.constant 0 : i32
    return %arg0, %c0_i32 : i32, i32
  }
}

</mosaic_0001>

<bundles_post_ra>
// kernel: smallnn_forward.1
= control target key start
LH: loop header
LB: loop body
LE: loop exit
PB: predicated region body
PF: predicated region fallthrough
CT: control target
= control target key end

     0   :  { %s848_s24 = smov 0   ;;  %s918_s0 = inlined_call_operand.vmem [shape: f32[250,16], index: 0, kind: input, shape index: {}]   ;;  %s919_s1 = inlined_call_operand.vmem [shape: bf16[16,64], index: 1, kind: input, shape index: {}]   ;;  %s920_s2 = inlined_call_operand.vmem [shape: f32[1,64], index: 2, kind: input, shape index: {}]   ;;  %s921_s3 = inlined_call_operand.vmem [shape: bf16[64,32], index: 3, kind: input, shape index: {}]   ;;  %s922_s4 = inlined_call_operand.vmem [shape: f32[1,32], index: 4, kind: input, shape index: {}]   ;;  %s923_s5 = inlined_call_operand.vmem [shape: bf16[32,4], index: 5, kind: input, shape index: {}]   ;;  %s924_s6 = inlined_call_operand.vmem [shape: f32[1,4], index: 6, kind: input, shape index: {}]   ;;  %s925_s7 = inlined_call_operand.vmem [shape: f32[250,4], index: 7, kind: output, shape index: {}]  }
   0x1 LB: > { %s695_s25 = sadd.s32 4294967295, %s806_s24   ;;  %p699_p0 = scmp.ge.s32.totalorder %s806_s24, 1  ;;  %s806_s24 = sphi %s848_s24, %s17_s24  }
   0x2   : > { %p238_p1 = scmp.lt.s32.totalorder %s806_s24, 5 }
   0x4   : > { %p239_p2 = pnand %p699_p0, %p238_p1 }
   0x5   : > { %v793_v0 = vld [vmem:[%s919_s1] sm:$0xff] (!%p239_p2)   ;;  %s700_s28 = sshll.u32 (!%p239_p2), %s695_s25, 3  ;;  %v795_v2 = vld [vmem:[%s921_s3 + $0x8] sm:$0xff] (!%p239_p2)   ;;  %vm310_vm0 = vcmask (!%p239_p2), 130048   ;;  %v796_v15 = vld [vmem:[%s921_s3 + $0x10] sm:$0xff] (!%p239_p2)   ;;  %vm439_vm1 = vcmask (!%p239_p2), 523264  }
   0x6   : > { %242 = sbr.rel (%p239_p2) target bundleno = 690 (0x2b2), region = 48  ;;  %p271_p3 = scmp.lt.s32.totalorder (!%p239_p2), %s700_s28, 31  ;;  %747 = vmatprep.subr.bf16.mxu0 (!%p239_p2), %v793_v0  ;;  %v794_v1 = vld [vmem:[%s921_s3] sm:$0xff] (!%p239_p2)   ;;  %v797_v16 = vld [vmem:[%s921_s3 + $0x18] sm:$0xff] (!%p239_p2)   ;;  %v799_v47 = vld [vmem:[%s923_s5 + $0x8] sm:$0xff] (!%p239_p2)   ;;  %vm552_vm2 = vcmask (!%p239_p2), 261120  }
   0x7   : > { %748 = vmatpush3.bf16.msra.mxu0 (!%p239_p2), %v793_v0  ;;  %757 = vmatprep.subr.bf16.mxu1 (!%p239_p2), %v794_v1  ;;  %v798_v17 = vld [vmem:[%s923_s5] sm:$0xff] (!%p239_p2)   ;;  %vm630_vm3 = vcmask (!%p239_p2), 31744  }
   0x8   : > { %758 = vmatpush3.bf16.msra.mxu1 (!%p239_p2), %v794_v1  ;;  %773 = vmatprep.subr.bf16.mxu0 (!%p239_p2), %v798_v17  ;;  %v704_v18 = vld [vmem:[%s920_s2] ss:$0 sm:$0xff] (!%p239_p2) }
   0x9   : > { %759 = vmatprep.subr.bf16.mxu1 (!%p239_p2), %v795_v2  ;;  %v710_v48 = vld [vmem:[%s922_s4] ss:$0 sm:$0xff] (!%p239_p2) }
   0xc   : > { %760 = vmatpush3.bf16.msra.mxu1 (!%p239_p2), %v795_v2 }
   0xd   : > { %s927_s28 = smov (!%p271_p3, %s700_s28), 31  ;;  %761 = vmatprep.subr.bf16.mxu1 %v796_v15 }
   0xe   : > { %s701_s10 = sshll.u32 %s927_s28, 3 }
   0xf   : > { %s274_s13 = scalar_lea.vmem %s918_s0, %s701_s10  ;;  %s280_s9 = scalar_lea.vmem %s925_s7, %s701_s10 }
  0x10   : > { %v283_v3 = vld [vmem:[%s274_s13] sm:$0xff]  ;;  %v284_v4 = vld [vmem:[%s274_s13 + $0x8] sm:$0xff]  ;;  %v285_v5 = vld [vmem:[%s274_s13 + $0x10] sm:$0xff]  ;;  %762 = vmatpush3.bf16.msra.mxu1 %v796_v15 }
  0x11   : > { %v291_v6 = vpack.c.bf16 %v284_v4, %v283_v3  ;;  %v286_v7 = vld [vmem:[%s274_s13 + $0x18] sm:$0xff]  ;;  %v287_v8 = vld [vmem:[%s274_s13 + $0x20] sm:$0xff]  ;;  %v288_v9 = vld [vmem:[%s274_s13 + $0x28] sm:$0xff]  ;;  %763 = vmatprep.subr.bf16.mxu1 %v797_v16 }
  0x12   : > { %v292_v10 = vpack.c.bf16 %v286_v7, %v285_v5  ;;  %v293_v11 = vpack.c.bf16 %v288_v9, %v287_v8  ;;  %v289_v12 = vld [vmem:[%s274_s13 + $0x30] sm:$0xff]  ;;  %v290_v13 = vld [vmem:[%s274_s13 + $0x38] sm:$0xff] }
  0x13   : > { %749 = vmatprep.mubr.msk.bf16.mxu0 %vm310_vm0, %v291_v6  ;;  %v294_v14 = vpack.c.bf16 %v290_v13, %v289_v12  ;;  %v719_v13 = vld [vmem:[%s924_s6] ss:$0 sm:$0xff] }
  0x14   : > { %750 = vmatmul.mubr.msk.bf16.vlgmr.msra.gmra.mrb[0].mxu0 %vm310_vm0, %v292_v10  ;;  %764 = vmatpush3.bf16.msra.mxu1 %v797_v16 }
  0x15   : > { %753 = vmatprep.mubr.msk.bf16.mxu0 %vm310_vm0, %v293_v11  ;;  %774 = vmatpush3.bf16.msra.mxu0 %v798_v17 }
  0x16   : > { %775 = vmatprep.subr.bf16.mxu0 %v799_v47 }
  0x19   : > { %776 = vmatpush3.bf16.msra.mxu0 %v799_v47 }
  0x1c   : > { %754 = vmatmul.mubr.msk.bf16.gmra.mrb[4].mxu0 %vm310_vm0, %v294_v14 }
  0xe7   : > { %v751_v19 = vpop.f32.mrb[0].mxu0 }
  0xe8   : > { %v366_v20 = vadd.f32 %v751_v19, %v704_v18  ;;  %v357_v21 = vpop.f32.mrb[1].mxu0 }
  0xe9   : > { %v358_v22 = vadd.f32 %v704_v18, %v357_v21  ;;  %v752_v23 = vpop.f32.mrb[2].mxu0 }
  0xea   : > { %v369_v24 = vadd.f32 %v752_v23, %v704_v18  ;;  %v360_v25 = vpop.f32.mrb[3].mxu0  ;;  %v390_v27 = vmax.f32 %v366_v20, 0.0 }
  0xeb   : > { %v361_v26 = vadd.f32 %v704_v18, %v360_v25  ;;  %v388_v29 = vmax.f32 %v358_v22, 0.0 }
  0xec   : > { %v391_v28 = vmax.f32 %v369_v24, 0.0 }
  0xed   : > { %v389_v30 = vmax.f32 %v361_v26, 0.0 }
  0xee   : > { %v397_v31 = vpack.c.bf16 %v391_v28, %v390_v27 }
  0xef   : > { %v755_v32 = vpop.f32.mrb[4].mxu0  ;;  %v396_v33 = vpack.c.bf16 %v389_v30, %v388_v29 }
  0xf0   : > { %v382_v34 = vadd.f32 %v755_v32, %v704_v18  ;;  %v373_v35 = vpop.f32.mrb[5].mxu0 }
  0xf1   : > { %v374_v36 = vadd.f32 %v704_v18, %v373_v35  ;;  %v756_v37 = vpop.f32.mrb[6].mxu0  ;;  %765 = vmatprep.mubr.msk.bf16.mxu1 %vm439_vm1, %v396_v33 }
  0xf2   : > { %v385_v38 = vadd.f32 %v756_v37, %v704_v18  ;;  %v376_v39 = vpop.f32.mrb[7].mxu0  ;;  %766 = vmatmul.mubr.msk.bf16.vlgmr.msra.gmra.mrb[0].mxu1 %vm439_vm1, %v397_v31  ;;  %v394_v41 = vmax.f32 %v382_v34, 0.0 }
  0xf3   : > { %v377_v40 = vadd.f32 %v704_v18, %v376_v39  ;;  %v392_v43 = vmax.f32 %v374_v36, 0.0 }
  0xf4   : > { %v395_v42 = vmax.f32 %v385_v38, 0.0 }
  0xf5   : > { %v393_v44 = vmax.f32 %v377_v40, 0.0 }
  0xf6   : > { %v399_v45 = vpack.c.bf16 %v395_v42, %v394_v41 }
  0xf7   : > { %v398_v46 = vpack.c.bf16 %v393_v44, %v392_v43 }
  0xf9   : > { %769 = vmatprep.mubr.msk.bf16.mxu1 %vm439_vm1, %v398_v46 }
  0xfa   : > { %770 = vmatmul.mubr.msk.bf16.gmra.mrb[4].mxu1 %vm439_vm1, %v399_v45 }
 0x1c5   : > { %v767_v49 = vpop.f32.mrb[0].mxu1 }
 0x1c6   : > { %v495_v50 = vadd.f32 %v767_v49, %v710_v48  ;;  %v486_v51 = vpop.f32.mrb[1].mxu1 }
 0x1c7   : > { %v487_v52 = vadd.f32 %v710_v48, %v486_v51  ;;  %v768_v53 = vpop.f32.mrb[2].mxu1 }
 0x1c8   : > { %v498_v54 = vadd.f32 %v768_v53, %v710_v48  ;;  %v489_v55 = vpop.f32.mrb[3].mxu1  ;;  %v519_v57 = vmax.f32 %v495_v50, 0.0 }
 0x1c9   : > { %v490_v56 = vadd.f32 %v710_v48, %v489_v55  ;;  %v517_v59 = vmax.f32 %v487_v52, 0.0 }
 0x1ca   : > { %v520_v58 = vmax.f32 %v498_v54, 0.0 }
 0x1cb   : > { %v518_v60 = vmax.f32 %v490_v56, 0.0 }
 0x1cc   : > { %v526_v61 = vpack.c.bf16 %v520_v58, %v519_v57 }
 0x1cd   : > { %v525_v62 = vpack.c.bf16 %v518_v60, %v517_v59  ;;  %v771_v63 = vpop.f32.mrb[4].mxu1 }
 0x1ce   : > { %v511_v0 = vadd.f32 %v771_v63, %v710_v48  ;;  %v502_v1 = vpop.f32.mrb[5].mxu1 }
 0x1cf   : > { %v503_v2 = vadd.f32 %v710_v48, %v502_v1  ;;  %v772_v3 = vpop.f32.mrb[6].mxu1  ;;  %777 = vmatprep.mubr.msk.bf16.mxu0 %vm552_vm2, %v525_v62 }
 0x1d0   : > { %v514_v4 = vadd.f32 %v772_v3, %v710_v48  ;;  %v505_v5 = vpop.f32.mrb[7].mxu1  ;;  %778 = vmatmul.mubr.msk.bf16.vlgmr.msra.gmra.mrb[8].mxu0 %vm552_vm2, %v526_v61  ;;  %v523_v7 = vmax.f32 %v511_v0, 0.0 }
 0x1d1   : > { %v506_v6 = vadd.f32 %v710_v48, %v505_v5  ;;  %v521_v9 = vmax.f32 %v503_v2, 0.0 }
 0x1d2   : > { %v524_v8 = vmax.f32 %v514_v4, 0.0 }
 0x1d3   : > { %v522_v10 = vmax.f32 %v506_v6, 0.0 }
 0x1d4   : > { %v528_v11 = vpack.c.bf16 %v524_v8, %v523_v7 }
 0x1d5   : > { %v527_v12 = vpack.c.bf16 %v522_v10, %v521_v9 }
 0x1d7   : > { %781 = vmatprep.mubr.msk.bf16.mxu0 %vm552_vm2, %v527_v12 }
 0x1d8   : > { %782 = vmatmul.mubr.msk.bf16.gmra.mrb[12].mxu0 %vm552_vm2, %v528_v11 }
 0x2a3   : > { %v779_v14 = vpop.f32.mrb[8].mxu0 }
 0x2a4   : > { %v608_v15 = vadd.f32 %v779_v14, %v719_v13  ;;  %v599_v16 = vpop.f32.mrb[9].mxu0 }
 0x2a5   : > { %v600_v17 = vadd.f32 %v719_v13, %v599_v16  ;;  %v780_v18 = vpop.f32.mrb[10].mxu0 }
 0x2a6   : > { %633 = vst.msk [vmem:[%s280_s9 + $0x10] sm:$0xff] %vm630_vm3, %v608_v15  ;;  %v611_v19 = vadd.f32 %v780_v18, %v719_v13  ;;  %v602_v20 = vpop.f32.mrb[11].mxu0 }
 0x2a7   : > { %631 = vst.msk [vmem:[%s280_s9] sm:$0xff] %vm630_vm3, %v600_v17  ;;  %v603_v21 = vadd.f32 %v719_v13, %v602_v20 }
 0x2a8   : > { %634 = vst.msk [vmem:[%s280_s9 + $0x18] sm:$0xff] %vm630_vm3, %v611_v19 }
 0x2a9   : > { %632 = vst.msk [vmem:[%s280_s9 + $0x8] sm:$0xff] %vm630_vm3, %v603_v21 }
 0x2ab   : > { %v783_v22 = vpop.f32.mrb[12].mxu0 }
 0x2ac   : > { %v624_v23 = vadd.f32 %v783_v22, %v719_v13  ;;  %v615_v24 = vpop.f32.mrb[13].mxu0 }
 0x2ad   : > { %v616_v25 = vadd.f32 %v719_v13, %v615_v24  ;;  %v784_v26 = vpop.f32.mrb[14].mxu0 }
 0x2ae   : > { %637 = vst.msk [vmem:[%s280_s9 + $0x30] sm:$0xff] %vm630_vm3, %v624_v23  ;;  %v627_v27 = vadd.f32 %v784_v26, %v719_v13  ;;  %v618_v28 = vpop.f32.mrb[15].mxu0 }
 0x2af   : > { %635 = vst.msk [vmem:[%s280_s9 + $0x20] sm:$0xff] %vm630_vm3, %v616_v25  ;;  %v619_v29 = vadd.f32 %v719_v13, %v618_v28 }
 0x2b0   : > { %638 = vst.msk [vmem:[%s280_s9 + $0x38] sm:$0xff] %vm630_vm3, %v627_v27 }
 0x2b1   : > { %636 = vst.msk [vmem:[%s280_s9 + $0x28] sm:$0xff] %vm630_vm3, %v619_v29 }
 0x2b2 PF: > { %s17_s24 = sadd.s32 1, %s806_s24  }
 0x2b3   : > { %p14_p4 = scmp.ge.s32.totalorder %s17_s24, 6  }
 0x2b5   :  { %16 = sbr.rel (!%p14_p4) target bundleno = 1 (0x1), region = 78 }

</bundles_post_ra>
